<compile_context>
chip_gen: v6e
topology: v6e:2x2x1
jax: 0.10.0
libtpu: 0.0.40
codegen_flags: <defaults>
</compile_context>

<pallas_src>
import math

import jax
import jax.numpy as jnp
from jax.experimental import pallas as pl
from jax.experimental.pallas import tpu as pltpu


def _round_up(x, m):
    return (x + m - 1) // m * m


# ---------------------------------------------------------------------------
# Kernel: tiled gated matmul  y = (x * z) @ W_km + bias
#   x_ref:    (tm, tk)  f32
#   z_ref:    (1,  tk)  f32   (gate, broadcast over rows)
#   w_ref:    (tk, tn)  compute_dtype (K-major weight, prepared once)
#   bias_ref: (1,  tn)  f32
#   y_ref:    (tm, tn)  f32   (resident across the K grid axis -> accumulator)
# ---------------------------------------------------------------------------
def gated_linear_kernel(x_ref, z_ref, w_ref, bias_ref, y_ref):
    kk = pl.program_id(2)

    @pl.when(kk == 0)
    def _():
        # bias-init the resident output tile (replaces zero-init + final add)
        y_ref[...] = jnp.broadcast_to(bias_ref[...], y_ref.shape)

    # Gate the activations in f32 (cheap VPU filler under an MXU-bound loop),
    # then cast only the MXU LHS operand; W is already in compute_dtype.
    xg = x_ref[...] * z_ref[...]                          # (tm, tk) * (1, tk)
    y_ref[...] += jnp.dot(xg.astype(w_ref.dtype), w_ref[...],
                          preferred_element_type=jnp.float32)


# ---------------------------------------------------------------------------
# Gate (binary_concrete forward value) — tiny O(in_feat) elementwise op,
# computed once per call in the wrapper.
# ---------------------------------------------------------------------------
def _compute_gate(beta, *, t, hard, k, use_noise, training, rng_key):
    beta = jnp.asarray(beta, jnp.float32)
    if training:
        logits = beta
        if use_noise:
            if rng_key is None:
                raise ValueError("rng_key is required for the noisy training path")
            eps = jnp.finfo(jnp.float32).tiny
            u = jax.random.uniform(rng_key, beta.shape, jnp.float32) + eps
            logits = beta + (jnp.log(u) - jnp.log1p(-u))
        z_soft = jax.nn.sigmoid(logits / t)
    else:
        z_soft = jax.nn.sigmoid(beta * k)                 # binary_concrete(beta, 1/k)
    if hard:
        # TODO(synk): forward value only; straight-through gradient would need
        # a custom_vjp around this gate.
        return (z_soft > 0.5).astype(jnp.float32)
    return z_soft


# ---------------------------------------------------------------------------
# One-time parameter preparation (hoisted out of the per-call path):
# pad, transpose W to K-major, cast W to compute_dtype.
# ---------------------------------------------------------------------------
def prepare_params(weight, bias, beta, *, compute_dtype=jnp.float32,
                   tn=512, tk=1024, ensure_two_n_blocks=True):
    weight = jnp.asarray(weight, jnp.float32)
    bias = jnp.asarray(bias, jnp.float32)
    beta = jnp.asarray(beta, jnp.float32)
    out_feat, in_feat = weight.shape

    n_full = _round_up(out_feat, 128)
    k_full = _round_up(in_feat, 128)
    tn = min(tn, n_full)
    tk = min(tk, k_full)
    # v7x megacore: prefer >=2 blocks along the (parallel) N axis when possible
    # so both TensorCores get work even when the M grid is 1.
    if ensure_two_n_blocks and n_full >= 2 * 128:
        tn = min(tn, max(128, (n_full // 2) // 128 * 128))

    Np = _round_up(out_feat, tn)
    Kp = _round_up(in_feat, tk)

    w_p = jnp.pad(weight, ((0, Np - out_feat), (0, Kp - in_feat)))
    w_km = jnp.transpose(w_p).astype(compute_dtype)       # (Kp, Np), K-major
    bias_p = jnp.pad(bias, (0, Np - out_feat)).reshape(1, Np)

    return dict(w_km=w_km, bias_p=bias_p, beta=beta,
                in_feat=in_feat, out_feat=out_feat,
                Np=Np, Kp=Kp, tn=tn, tk=tk)


# ---------------------------------------------------------------------------
# Per-call forward: only x is padded per call.
# ---------------------------------------------------------------------------
def dense_layer_forward(x, params, *, t=1.0, hard=False, k=1.0, use_noise=True,
                        training=False, rng_key=None, tm=256, w_buffer_count=2):
    x = jnp.asarray(x, jnp.float32)
    B, in_feat = x.shape
    assert in_feat == params["in_feat"]
    out_feat = params["out_feat"]
    Np, Kp, tn, tk = params["Np"], params["Kp"], params["tn"], params["tk"]
    w_km, bias_p = params["w_km"], params["bias_p"]

    # gate (binary_concrete forward value)
    z = _compute_gate(params["beta"], t=t, hard=hard, k=k, use_noise=use_noise,
                      training=training, rng_key=rng_key)
    z_p = jnp.pad(z, (0, Kp - in_feat)).reshape(1, Kp)

    # per-call tiling of the batch dim only
    tm = min(tm, _round_up(B, 8))
    Mp = _round_up(B, tm)
    x_p = jnp.pad(x, ((0, Mp - B), (0, Kp - in_feat)))

    grid = (Mp // tm, Np // tn, Kp // tk)
    m_blocks, n_blocks, _ = grid

    # advisory cost estimate reflecting actual re-reads across the grid
    cost = pl.CostEstimate(
        flops=2 * Mp * Np * Kp,
        transcendentals=0,
        bytes_accessed=(int(x_p.size) * 4 * n_blocks
                        + int(w_km.size) * w_km.dtype.itemsize * m_blocks
                        + int(z_p.size) * 4 * m_blocks * n_blocks
                        + int(bias_p.size) * 4 * m_blocks
                        + Mp * Np * 4),
    )

    # optional deeper pipelining on the weight stream (v7x weight-streaming)
    w_spec_kwargs = {}
    if w_buffer_count is not None and w_buffer_count != 2:
        w_spec_kwargs["pipeline_mode"] = pl.Buffered(w_buffer_count)
    w_spec = pl.BlockSpec((tk, tn), lambda i, j, kk: (kk, j), **w_spec_kwargs)

    y_p = pl.pallas_call(
        gated_linear_kernel,
        out_shape=jax.ShapeDtypeStruct((Mp, Np), jnp.float32),
        grid_spec=pltpu.PrefetchScalarGridSpec(
            num_scalar_prefetch=0,
            grid=grid,
            in_specs=[
                pl.BlockSpec((tm, tk), lambda i, j, kk: (i, kk)),   # x
                pl.BlockSpec((1, tk), lambda i, j, kk: (0, kk)),    # z (gate)
                w_spec,                                             # W (K-major)
                pl.BlockSpec((1, tn), lambda i, j, kk: (0, j)),     # bias
            ],
            out_specs=pl.BlockSpec((tm, tn), lambda i, j, kk: (i, j)),
        ),
        compiler_params=pltpu.CompilerParams(
            dimension_semantics=("parallel", "parallel", "arbitrary"),
            vmem_limit_bytes=48 * 1024 * 1024,
        ),
        cost_estimate=cost,
    )(x_p, z_p, w_km, bias_p)

    return y_p[:B, :out_feat], z


def init_params(key, in_feat, out_feat):
    """Deterministic init matching the PyTorch __init__."""
    kw, kb = jax.random.split(key)
    bound = math.sqrt(6.0 / in_feat)   # kaiming_uniform_, fan_in, leaky_relu
    weight = jax.random.uniform(kw, (out_feat, in_feat),
                                dtype=jnp.float32, minval=-bound, maxval=bound)
    bias = jnp.zeros((out_feat,), dtype=jnp.float32)             # zeros_
    beta = jax.random.normal(kb, (in_feat,), dtype=jnp.float32)  # normal(0, 1)
    return weight, bias, beta


if __name__ == "__main__":
    key = jax.random.PRNGKey(0)
    k_x, k_p, k_x2, k_p2, k_noise = jax.random.split(key, 5)

    # ---- small shape, f32 weights, single-tile grid ------------------------
    B, in_feat, out_feat = 8, 32, 16
    x = jax.random.normal(k_x, (B, in_feat), dtype=jnp.float32)
    weight, bias, beta = init_params(k_p, in_feat, out_feat)
    params_f32 = prepare_params(weight, bias, beta, compute_dtype=jnp.float32)

    y, z = dense_layer_forward(x, params_f32, k=1.0, hard=False, training=False)
    jax.block_until_ready((y, z))
    z_ref = jax.nn.sigmoid(beta * 1.0)
    y_ref = x @ (weight * z_ref[None, :]).T + bias
    assert jnp.allclose(y, y_ref, atol=1e-5, rtol=1e-5)
    assert jnp.allclose(z, z_ref, atol=1e-6, rtol=1e-6)
    assert not bool(jnp.isnan(y).any())

    # ---- hard-gate forward value -------------------------------------------
    y_h, z_h = dense_layer_forward(x, params_f32, k=2.0, hard=True, training=False)
    jax.block_until_ready((y_h, z_h))
    z_h_ref = (jax.nn.sigmoid(beta * 2.0) > 0.5).astype(jnp.float32)
    y_h_ref = x @ (weight * z_h_ref[None, :]).T + bias
    assert jnp.allclose(y_h, y_h_ref, atol=1e-5, rtol=1e-5)
    assert jnp.allclose(z_h, z_h_ref)

    # ---- noisy training path (consistency check against returned z) --------
    y_n, z_n = dense_layer_forward(x, params_f32, t=0.5, training=True,
                                   use_noise=True, rng_key=k_noise)
    jax.block_until_ready((y_n, z_n))
    y_n_ref = x @ (weight * z_n[None, :]).T + bias
    assert bool(jnp.all((z_n > 0) & (z_n < 1)))
    assert jnp.allclose(y_n, y_n_ref, atol=1e-5, rtol=1e-5)

    # ---- larger shape exercising the (M,N,K) grid: f32 and bf16 weights ----
    B2, in2, out2 = 64, 2000, 384
    x2 = jax.random.normal(k_x2, (B2, in2), dtype=jnp.float32)
    w2, b2, be2 = init_params(k_p2, in2, out2)
    z2_ref = jax.nn.sigmoid(be2)
    y2_ref = jnp.dot(x2 * z2_ref[None, :], w2.T,
                     precision=jax.lax.Precision.HIGHEST) + b2

    params2_f32 = prepare_params(w2, b2, be2, compute_dtype=jnp.float32)
    y2, z2 = dense_layer_forward(x2, params2_f32, k=1.0)
    jax.block_until_ready((y2, z2))
    rel = jnp.linalg.norm(y2 - y2_ref) / jnp.linalg.norm(y2_ref)
    assert float(rel) < 1e-3
    assert jnp.allclose(z2, z2_ref, atol=1e-6, rtol=1e-6)

    params2_bf16 = prepare_params(w2, b2, be2, compute_dtype=jnp.bfloat16)
    y2b, _ = dense_layer_forward(x2, params2_bf16, k=1.0)
    jax.block_until_ready(y2b)
    rel_b = jnp.linalg.norm(y2b - y2_ref) / jnp.linalg.norm(y2_ref)
    assert float(rel_b) < 2e-2

    print("KERNEL_OK")
</pallas_src>

<mosaic_0001>
module attributes {stable_mosaic.version = 11 : i64} {
  func.func @gated_linear_kernel(%arg0: i32, %arg1: i32, %arg2: i32, %arg3: memref<8x128xf32, #tpu.memory_space<vmem>>, %arg4: memref<1x128xf32, #tpu.memory_space<vmem>>, %arg5: memref<128x128xf32, #tpu.memory_space<vmem>>, %arg6: memref<1x128xf32, #tpu.memory_space<vmem>>, %arg7: memref<8x128xf32, #tpu.memory_space<vmem>>) attributes {dimension_semantics = [#tpu.dimension_semantics<parallel>, #tpu.dimension_semantics<parallel>, #tpu.dimension_semantics<arbitrary>], iteration_bounds = array<i64: 1, 1, 1>, scalar_prefetch = 0 : i64, scratch_operands = 0 : i64, tpu.core_type = #tpu.core_type<tc>, window_params = [{transform_indices = @transform_0, window_bounds = array<i64: 8, 128>}, {transform_indices = @transform_1, window_bounds = array<i64: 1, 128>}, {transform_indices = @transform_2, window_bounds = array<i64: 128, 128>}, {transform_indices = @transform_3, window_bounds = array<i64: 1, 128>}, {transform_indices = @transform_4, window_bounds = array<i64: 8, 128>}]} {
    %c0_i32 = arith.constant 0 : i32
    %0 = arith.cmpi eq, %arg2, %c0_i32 : i32
    %1 = arith.extui %0 : i1 to i32
    %c0_i32_0 = arith.constant 0 : i32
    %2 = arith.cmpi ne, %1, %c0_i32_0 : i32
    scf.if %2 {
      %c0_10 = arith.constant 0 : index
      %c0_11 = arith.constant 0 : index
      %12 = vector.load %arg6[%c0_10, %c0_11] : memref<1x128xf32, #tpu.memory_space<vmem>>, vector<1x128xf32>
      %13 = vector.shape_cast %12 : vector<1x128xf32> to vector<1x128xf32>
      %14 = vector.broadcast %13 : vector<1x128xf32> to vector<8x128xf32>
      %c0_12 = arith.constant 0 : index
      %c0_13 = arith.constant 0 : index
      %15 = vector.load %arg7[%c0_12, %c0_13] : memref<8x128xf32, #tpu.memory_space<vmem>>, vector<8x128xf32>
      tpu.vector_store %arg7[%c0_12, %c0_13], %14 {strides = array<i32>} : memref<8x128xf32, #tpu.memory_space<vmem>>, vector<8x128xf32>,
    } else {
    }
    %c0 = arith.constant 0 : index
    %c0_1 = arith.constant 0 : index
    %3 = vector.load %arg3[%c0, %c0_1] : memref<8x128xf32, #tpu.memory_space<vmem>>, vector<8x128xf32>
    %c0_2 = arith.constant 0 : index
    %c0_3 = arith.constant 0 : index
    %4 = vector.load %arg4[%c0_2, %c0_3] : memref<1x128xf32, #tpu.memory_space<vmem>>, vector<1x128xf32>
    %5 = vector.broadcast %4 : vector<1x128xf32> to vector<8x128xf32>
    %6 = arith.mulf %3, %5 : vector<8x128xf32>
    %c0_4 = arith.constant 0 : index
    %c0_5 = arith.constant 0 : index
    %7 = vector.load %arg7[%c0_4, %c0_5] : memref<8x128xf32, #tpu.memory_space<vmem>>, vector<8x128xf32>
    %c0_6 = arith.constant 0 : index
    %c0_7 = arith.constant 0 : index
    %8 = vector.load %arg5[%c0_6, %c0_7] : memref<128x128xf32, #tpu.memory_space<vmem>>, vector<128x128xf32>
    %cst = arith.constant dense<0.000000e+00> : vector<8x128xf32>
    %9 = tpu.matmul %6, %8, %cst {dimension_numbers = #tpu.dot_dimension_numbers<[1], [0], [0], [1], [0, 0, 1, 1], [], []>} : vector<8x128xf32>, vector<128x128xf32>, vector<8x128xf32> -> vector<8x128xf32>
    %10 = arith.addf %7, %9 : vector<8x128xf32>
    %c0_8 = arith.constant 0 : index
    %c0_9 = arith.constant 0 : index
    %11 = vector.load %arg7[%c0_8, %c0_9] : memref<8x128xf32, #tpu.memory_space<vmem>>, vector<8x128xf32>
    tpu.vector_store %arg7[%c0_8, %c0_9], %10 {strides = array<i32>} : memref<8x128xf32, #tpu.memory_space<vmem>>, vector<8x128xf32>,
    return
  }
  func.func @transform_0(%arg0: i32, %arg1: i32, %arg2: i32) -> (i32, i32) {
    %c0_i32 = arith.constant 0 : i32
    return %arg0, %arg2 : i32, i32
  }
  func.func @transform_1(%arg0: i32, %arg1: i32, %arg2: i32) -> (i32, i32) {
    %c0_i32 = arith.constant 0 : i32
    %c0_i32_0 = arith.constant 0 : i32
    return %c0_i32, %arg2 : i32, i32
  }
  func.func @transform_2(%arg0: i32, %arg1: i32, %arg2: i32) -> (i32, i32) {
    %c0_i32 = arith.constant 0 : i32
    return %arg2, %arg1 : i32, i32
  }
  func.func @transform_3(%arg0: i32, %arg1: i32, %arg2: i32) -> (i32, i32) {
    %c0_i32 = arith.constant 0 : i32
    %c0_i32_0 = arith.constant 0 : i32
    return %c0_i32, %arg1 : i32, i32
  }
  func.func @transform_4(%arg0: i32, %arg1: i32, %arg2: i32) -> (i32, i32) {
    %c0_i32 = arith.constant 0 : i32
    return %arg0, %arg1 : i32, i32
  }
}

</mosaic_0001>

<bundles_post_ra>
// kernel: tpu_custom_call.1
= control target key start
LH: loop header
LB: loop body
LE: loop exit
PB: predicated region body
PF: predicated region fallthrough
CT: control target
= control target key end

     0   :  { %9 = vsyncpa [#allocation3], 0  ;;  %s344_s0 = inlined_call_operand.hbm [shape: f32[8,128], index: 0, kind: input, shape index: {}]   ;;  %s345_s1 = inlined_call_operand.vmem [shape: f32[1,128], index: 1, kind: input, shape index: {}]   ;;  %s346_s2 = inlined_call_operand.hbm [shape: f32[128,128], index: 2, kind: input, shape index: {}]   ;;  %s347_s3 = inlined_call_operand.vmem [shape: f32[1,128], index: 3, kind: input, shape index: {}]   ;;  %s348_s4 = inlined_call_operand.hbm [shape: f32[8,128], index: 4, kind: output, shape index: {}]  }
   0x1   :  { %10 = vsyncpa [#allocation6], 0 }
   0x2   :  { %11 = vsyncpa [#allocation4], 0  ;;  %s297_s15 = smov [#allocation2]   ;;  %s298_s17 = smov [#allocation5]  }
   0x3   :  { %s18_s16 = sshll.u32 %s297_s15, 4  ;;  %s29_s18 = sshll.u32 %s298_s17, 4  ;;  %s19_s16 = int_to_ptr.vmem [resolvable:$true] %s18_s16  ;;  %s30_s18 = int_to_ptr.vmem [resolvable:$true] %s29_s18 }
   0x4   :  { %s239_s19 = scalar_lea.vmem %s19_s16, 128  ;;  %p244_p1 = scmp.lt.s32.totalorder %s19_s16, %s19_s16 }
   0x5   :  { %p240_p0 = scmp.ne.s32.totalorder %s19_s16, %s239_s19  ;;  %p245_p2 = scmp.lt.s32.totalorder %s239_s19, %s239_s19 }
   0x7   :  { %p246_p3 = por %p245_p2, %p244_p1 }
   0x9   :  { %p247_p4 = pnand %p246_p3, %p240_p0 }
   0xb   :  { %250 = shalt.err (!%p247_p4)
}
   0xc   :  { %21 = dma.hbm_to_vmem [thread:$0]  %s344_s0, 128, %s19_s16, [#allocation3]  }
   0xd   :  { %s259_s22 = scalar_lea.vmem %s30_s18, 2048  ;;  %p264_p6 = scmp.lt.s32.totalorder %s30_s18, %s30_s18 }
   0xe   :  { %p260_p5 = scmp.ne.s32.totalorder %s30_s18, %s259_s22  ;;  %p265_p7 = scmp.lt.s32.totalorder %s259_s22, %s259_s22 }
  0x10   :  { %p266_p8 = por %p265_p7, %p264_p6 }
  0x12   :  { %p267_p9 = pnand %p266_p8, %p260_p5 }
  0x14   :  { %270 = shalt.err (!%p267_p9)
}
  0x15   :  { %s299_s23 = smov 128   ;;  %s300_s24 = smov 8  }
  0x16   :  { %35 = dma.hbm_to_vmem [thread:$0]  %s346_s2, 2048, %s30_s18, [#allocation6], %s299_s23, %s299_s23, %s300_s24  }
  0x17   :  { %291 = dma.done.wait [#allocation3], 128  }
  0x18   :  { %292 = vsyncadd [#allocation3], 4294967168 }
  0x19   :  { %293 = dma.done.wait [#allocation6], 2048  }
  0x1a   :  { %294 = vsyncadd [#allocation6], 4294965248  ;;  %v301_v0 = vmov 0.0   ;;  %vm302_vm0 = vmmov 0   ;;  %v81_v1 = vld [vmem:[#allocation5 + $0x78] sm:$0xff]  ;;  %v80_v2 = vld [vmem:[#allocation5 + $0x70] sm:$0xff] }
  0x1b   :  { %189 = vmatprep.subr.mxu0 %v301_v0  ;;  %221 = vmatprep.mubr.msk.f32.mxu0 %vm302_vm0, %v301_v0  ;;  %v79_v3 = vld [vmem:[#allocation5 + $0x68] sm:$0xff]  ;;  %v78_v4 = vld [vmem:[#allocation5 + $0x60] sm:$0xff]  ;;  %v77_v5 = vld [vmem:[#allocation5 + $0x58] sm:$0xff]  ;;  %s303_s29 = smov [#allocation7]  }
  0x1c   :  { %190 = vmatpush3.msra.mxu0 %v81_v1  ;;  %v76_v6 = vld [vmem:[#allocation5 + $0x50] sm:$0xff]  ;;  %v75_v7 = vld [vmem:[#allocation5 + $0x48] sm:$0xff]  ;;  %v74_v8 = vld [vmem:[#allocation5 + $0x40] sm:$0xff]  ;;  %s160_s30 = sshll.u32 %s303_s29, 4  ;;  %s161_s30 = int_to_ptr.vmem [resolvable:$true] %s160_s30 }
  0x1d   :  { %191 = vmatprep.subr.mxu0 %v301_v0  ;;  %v73_v9 = vld [vmem:[#allocation5 + $0x38] sm:$0xff]  ;;  %v72_v10 = vld [vmem:[#allocation5 + $0x30] sm:$0xff]  ;;  %v71_v11 = vld [vmem:[#allocation5 + $0x28] sm:$0xff]  ;;  %p276_p11 = scmp.lt.s32.totalorder %s161_s30, %s161_s30 }
  0x1e   :  { %192 = vmatpush3.msra.mxu0 %v80_v2  ;;  %v70_v12 = vld [vmem:[#allocation5 + $0x20] sm:$0xff]  ;;  %v69_v13 = vld [vmem:[#allocation5 + $0x18] sm:$0xff]  ;;  %v68_v14 = vld [vmem:[#allocation5 + $0x10] sm:$0xff] }
  0x1f   :  { %193 = vmatprep.subr.mxu0 %v301_v0  ;;  %v56_v15 = vld [vmem:[#allocation2] sm:$0xff]  ;;  %v67_v17 = vld [vmem:[#allocation5 + $0x8] sm:$0xff]  ;;  %v66_v18 = vld [vmem:[#allocation5] sm:$0xff] }
  0x20   :  { %194 = vmatpush3.msra.mxu0 %v79_v3  ;;  %v171_v16 = vld [vmem:[%s345_s1] ss:$0 sm:$0xff]  ;;  %s271_s1 = scalar_lea.vmem %s161_s30, 128 }
  0x21   :  { %195 = vmatprep.subr.mxu0 %v301_v0  ;;  %v64_v19 = vmul.f32 %v171_v16, %v56_v15  ;;  %v170_v20 = vld [vmem:[%s347_s3] ss:$0 sm:$0xff]  ;;  %p272_p10 = scmp.ne.s32.totalorder %s161_s30, %s271_s1  ;;  %p277_p12 = scmp.lt.s32.totalorder %s271_s1, %s271_s1 }
  0x22   :  { %196 = vmatpush3.msra.mxu0 %v78_v4 }
  0x23   :  { %197 = vmatprep.subr.mxu0 %v301_v0  ;;  %p278_p13 = por %p277_p12, %p276_p11 }
  0x24   :  { %198 = vmatpush3.msra.mxu0 %v77_v5 }
  0x25   :  { %199 = vmatprep.subr.mxu0 %v301_v0  ;;  %p279_p0 = pnand %p278_p13, %p272_p10 }
  0x26   :  { %200 = vmatpush3.msra.mxu0 %v76_v6 }
  0x27   :  { %201 = vmatprep.subr.mxu0 %v301_v0 }
  0x28   :  { %202 = vmatpush3.msra.mxu0 %v75_v7 }
  0x29   :  { %203 = vmatprep.subr.mxu0 %v301_v0 }
  0x2a   :  { %204 = vmatpush3.msra.mxu0 %v74_v8 }
  0x2b   :  { %205 = vmatprep.subr.mxu0 %v301_v0 }
  0x2c   :  { %206 = vmatpush3.msra.mxu0 %v73_v9 }
  0x2d   :  { %207 = vmatprep.subr.mxu0 %v301_v0 }
  0x2e   :  { %208 = vmatpush3.msra.mxu0 %v72_v10 }
  0x2f   :  { %209 = vmatprep.subr.mxu0 %v301_v0 }
  0x30   :  { %210 = vmatpush3.msra.mxu0 %v71_v11 }
  0x31   :  { %211 = vmatprep.subr.mxu0 %v301_v0 }
  0x32   :  { %212 = vmatpush3.msra.mxu0 %v70_v12 }
  0x33   :  { %213 = vmatprep.subr.mxu0 %v301_v0 }
  0x34   :  { %214 = vmatpush3.msra.mxu0 %v69_v13 }
  0x35   :  { %215 = vmatprep.subr.mxu0 %v301_v0 }
  0x36   :  { %216 = vmatpush3.msra.mxu0 %v68_v14 }
  0x37   :  { %217 = vmatprep.subr.mxu0 %v301_v0 }
  0x38   :  { %218 = vmatpush3.msra.mxu0 %v67_v17 }
  0x39   :  { %219 = vmatprep.subr.mxu0 %v301_v0 }
  0x3a   :  { %220 = vmatpush3.msra.mxu0 %v66_v18 }
  0x3b   :  { %222 = vmatmul.mubr.f32.vlgmr.msra.gmra.mxu0 %v64_v19 }
  0xfb   :  { %v148_v21 = vpop.f32.mrf.mxu0 }
  0xfc   :  { %v152_v22 = vadd.f32 %v170_v20, %v148_v21 }
  0xfd   :  { %v223_v23 = vpop.f32.mrf.mxu0 }
  0xfe   :  { %153 = vst [vmem:[#allocation7] sm:$0xff] %v152_v22 }
  0xff   :  { %282 = shalt.err (!%p279_p0)
}
 0x100   :  { %163 = dma.vmem_to_hbm [thread:$0]  %s161_s30, 128, %s348_s4, [#allocation4]  }
 0x101   :  { %295 = dma.done.wait [#allocation4], 128  }
 0x102   :  { %296 = vsyncadd [#allocation4], 4294967168 }
 0x103   :  { %167 = vsyncpa [#allocation3], 1 }
 0x104   :  { %168 = vsyncpa [#allocation6], 1 }
 0x105   :  { %169 = vsyncpa [#allocation4], 1 }

</bundles_post_ra>
